<compile_context>
chip_gen: v5e
topology: v5e:2x2
jax: 0.10.0
libtpu: 0.0.40
codegen_flags: <defaults>
</compile_context>

<pallas_src>
import functools

import jax
import jax.numpy as jnp
from jax.experimental import pallas as pl
from jax.experimental.pallas import tpu as pltpu

_SUBLANE = 8  # sublane count (second-to-last dim of a vreg)


def _round_up(n, m):
    return ((n + m - 1) // m) * m


# --------------------------------------------------------------------------
# Fused kernel: the entire MLP for one batch tile.
#   refs = (x_ref, w0, b0, w1, b1, ..., wL, bL, o_ref)
#   w_i: (in_features, out_features) already transposed; b_i: (1, out_features)
# --------------------------------------------------------------------------
def _mlp_fused_kernel(*refs, num_hidden_layers, compute_dtype):
    x_ref = refs[0]
    o_ref = refs[-1]
    wb = refs[1:-1]

    h = x_ref[...].astype(jnp.float32)
    for i in range(num_hidden_layers):
        w = wb[2 * i][...]
        b = wb[2 * i + 1][...].astype(jnp.float32)
        h = jnp.dot(h.astype(compute_dtype), w.astype(compute_dtype),
                    preferred_element_type=jnp.float32) + b   # MXU + VPU (f32 acc)
        h = jnp.tanh(h)                                       # EUP, true hidden width
    w = wb[-2][...]
    b = wb[-1][...].astype(jnp.float32)
    y = jnp.dot(h.astype(compute_dtype), w.astype(compute_dtype),
                preferred_element_type=jnp.float32) + b       # final linear
    o_ref[...] = y.astype(o_ref.dtype)


# --------------------------------------------------------------------------
# Parameter prep: torch layout (out, in) -> transposed (in, out); bias -> (1, out).
# No lane padding — Mosaic pads the MXU operands internally, weights are tiny.
# Done once, outside the kernel.
# --------------------------------------------------------------------------
def prepare_params(params):
    return [(jnp.asarray(w).T, jnp.asarray(b).reshape(1, -1)) for w, b in params]


# --------------------------------------------------------------------------
# Wrapper: one pallas_call for the whole forward pass.
# --------------------------------------------------------------------------
def mlp_forward_fused(prepared_params, x, *, batch_tile=1024, use_bf16=False):
    B, in_dim = x.shape
    out_dim = prepared_params[-1][0].shape[1]
    num_hidden_layers = len(prepared_params) - 1

    # Batch tile: multiple of 8 sublanes, capped at `batch_tile`, and also
    # capped near B/2 so large batches give >= 2 tiles (both v7x TCs busy).
    tb = min(batch_tile, _round_up(pl.cdiv(B, 2), _SUBLANE))
    if tb >= B:
        tb = B          # full batch dim is always a legal block dim
    grid = pl.cdiv(B, tb)

    flat_wb = []
    # Input at its true feature width: last dim == full array dim -> legal.
    in_specs = [pl.BlockSpec((tb, in_dim), lambda i: (i, 0))]
    for wt, bp in prepared_params:
        flat_wb.extend([wt, bp])
        # Constant index_map -> weights/biases DMA'd once, VMEM resident.
        in_specs.append(pl.BlockSpec(wt.shape, lambda i: (0, 0)))
        in_specs.append(pl.BlockSpec(bp.shape, lambda i: (0, 0)))

    kernel = functools.partial(
        _mlp_fused_kernel,
        num_hidden_layers=num_hidden_layers,
        compute_dtype=jnp.bfloat16 if use_bf16 else jnp.float32)

    return pl.pallas_call(
        kernel,
        out_shape=jax.ShapeDtypeStruct((B, out_dim), x.dtype),
        grid_spec=pl.GridSpec(
            grid=(grid,),
            in_specs=in_specs,
            # True-width output: contiguous writeback, no post-kernel slice.
            out_specs=pl.BlockSpec((tb, out_dim), lambda i: (i, 0)),
        ),
        compiler_params=pltpu.CompilerParams(
            dimension_semantics=("parallel",),   # batch tiles shard across TCs
        ),
    )(x, *flat_wb)


# --------------------------------------------------------------------------
# Init mirroring the torch module's layer shapes (torch layout: (out, in)).
# --------------------------------------------------------------------------
def init_mlp_params(key, input_dim, output_dim, hidden_dim, num_layers,
                    dtype=jnp.float32):
    in_dim = max(input_dim, 1)
    dims = [(in_dim, hidden_dim)]
    dims += [(hidden_dim, hidden_dim)] * (num_layers - 1)
    dims += [(hidden_dim, output_dim)]

    params = []
    for (fan_in, fan_out) in dims:
        key, kw, kb = jax.random.split(key, 3)
        bound = 1.0 / jnp.sqrt(fan_in)   # torch nn.Linear default init range
        w = jax.random.uniform(kw, (fan_out, fan_in), dtype,
                               minval=-bound, maxval=bound)
        b = jax.random.uniform(kb, (fan_out,), dtype,
                               minval=-bound, maxval=bound)
        params.append((w, b))
    return params


def mlp_forward_ref(params, x, num_layers):
    """Pure-JAX reference (torch-layout weights) for correctness checking."""
    out = x
    for i in range(num_layers):
        w, b = params[i]
        out = jnp.tanh(out @ w.T + b)
    w, b = params[-1]
    return out @ w.T + b


if __name__ == "__main__":
    input_dim = 4
    output_dim = 6
    hidden_dim = 32
    num_layers = 3

    key = jax.random.PRNGKey(0)
    params = init_mlp_params(key, input_dim, output_dim, hidden_dim, num_layers)
    prepared = prepare_params(params)

    # Small single-tile case.
    key, kx = jax.random.split(key)
    x_small = jax.random.normal(kx, (8, input_dim), jnp.float32)
    y_small = jax.block_until_ready(mlp_forward_fused(prepared, x_small))
    y_small_ref = mlp_forward_ref(params, x_small, num_layers)
    assert y_small.shape == (8, output_dim)
    assert jnp.allclose(y_small, y_small_ref, atol=1e-5, rtol=1e-5), \
        "mismatch vs reference (small batch)"

    # Multi-tile case with a ragged last tile (exercises cdiv grid + masked writeback).
    key, kx2 = jax.random.split(key)
    x_big = jax.random.normal(kx2, (200, input_dim), jnp.float32)
    y_big = jax.block_until_ready(mlp_forward_fused(prepared, x_big))
    y_big_ref = mlp_forward_ref(params, x_big, num_layers)
    assert y_big.shape == (200, output_dim)
    assert jnp.allclose(y_big, y_big_ref, atol=1e-5, rtol=1e-5), \
        "mismatch vs reference (ragged multi-tile batch)"

    print("KERNEL_OK")
</pallas_src>

<mosaic_0001>
module attributes {stable_mosaic.version = 11 : i64} {
  func.func @_mlp_fused_kernel(%arg0: i32, %arg1: memref<8x4xf32, #tpu.memory_space<vmem>>, %arg2: memref<4x32xf32, #tpu.memory_space<vmem>>, %arg3: memref<1x32xf32, #tpu.memory_space<vmem>>, %arg4: memref<32x32xf32, #tpu.memory_space<vmem>>, %arg5: memref<1x32xf32, #tpu.memory_space<vmem>>, %arg6: memref<32x32xf32, #tpu.memory_space<vmem>>, %arg7: memref<1x32xf32, #tpu.memory_space<vmem>>, %arg8: memref<32x6xf32, #tpu.memory_space<vmem>>, %arg9: memref<1x6xf32, #tpu.memory_space<vmem>>, %arg10: memref<8x6xf32, #tpu.memory_space<vmem>>) attributes {dimension_semantics = [#tpu.dimension_semantics<parallel>], iteration_bounds = array<i64: 1>, scalar_prefetch = 0 : i64, scratch_operands = 0 : i64, tpu.core_type = #tpu.core_type<tc>, window_params = [{transform_indices = @transform_0, window_bounds = array<i64: 8, 4>}, {pipeline_mode = #tpu.pipeline_mode<synchronous>, transform_indices = @transform_1, window_bounds = array<i64: 4, 32>}, {pipeline_mode = #tpu.pipeline_mode<synchronous>, transform_indices = @transform_2, window_bounds = array<i64: 1, 32>}, {pipeline_mode = #tpu.pipeline_mode<synchronous>, transform_indices = @transform_3, window_bounds = array<i64: 32, 32>}, {pipeline_mode = #tpu.pipeline_mode<synchronous>, transform_indices = @transform_4, window_bounds = array<i64: 1, 32>}, {pipeline_mode = #tpu.pipeline_mode<synchronous>, transform_indices = @transform_5, window_bounds = array<i64: 32, 32>}, {pipeline_mode = #tpu.pipeline_mode<synchronous>, transform_indices = @transform_6, window_bounds = array<i64: 1, 32>}, {pipeline_mode = #tpu.pipeline_mode<synchronous>, transform_indices = @transform_7, window_bounds = array<i64: 32, 6>}, {pipeline_mode = #tpu.pipeline_mode<synchronous>, transform_indices = @transform_8, window_bounds = array<i64: 1, 6>}, {transform_indices = @transform_9, window_bounds = array<i64: 8, 6>}]} {
    %c0 = arith.constant 0 : index
    %c0_0 = arith.constant 0 : index
    %0 = vector.load %arg1[%c0, %c0_0] : memref<8x4xf32, #tpu.memory_space<vmem>>, vector<8x4xf32>
    %c0_1 = arith.constant 0 : index
    %c0_2 = arith.constant 0 : index
    %1 = vector.load %arg2[%c0_1, %c0_2] : memref<4x32xf32, #tpu.memory_space<vmem>>, vector<4x32xf32>
    %c0_3 = arith.constant 0 : index
    %c0_4 = arith.constant 0 : index
    %2 = vector.load %arg3[%c0_3, %c0_4] : memref<1x32xf32, #tpu.memory_space<vmem>>, vector<1x32xf32>
    %cst = arith.constant dense<0.000000e+00> : vector<8x32xf32>
    %3 = tpu.matmul %0, %1, %cst {dimension_numbers = #tpu.dot_dimension_numbers<[1], [0], [0], [1], [0, 0, 1, 1], [], []>} : vector<8x4xf32>, vector<4x32xf32>, vector<8x32xf32> -> vector<8x32xf32>
    %4 = vector.broadcast %2 : vector<1x32xf32> to vector<8x32xf32>
    %5 = arith.addf %3, %4 : vector<8x32xf32>
    %6 = math.tanh %5 : vector<8x32xf32>
    %c0_5 = arith.constant 0 : index
    %c0_6 = arith.constant 0 : index
    %7 = vector.load %arg4[%c0_5, %c0_6] : memref<32x32xf32, #tpu.memory_space<vmem>>, vector<32x32xf32>
    %c0_7 = arith.constant 0 : index
    %c0_8 = arith.constant 0 : index
    %8 = vector.load %arg5[%c0_7, %c0_8] : memref<1x32xf32, #tpu.memory_space<vmem>>, vector<1x32xf32>
    %cst_9 = arith.constant dense<0.000000e+00> : vector<8x32xf32>
    %9 = tpu.matmul %6, %7, %cst_9 {dimension_numbers = #tpu.dot_dimension_numbers<[1], [0], [0], [1], [0, 0, 1, 1], [], []>} : vector<8x32xf32>, vector<32x32xf32>, vector<8x32xf32> -> vector<8x32xf32>
    %10 = vector.broadcast %8 : vector<1x32xf32> to vector<8x32xf32>
    %11 = arith.addf %9, %10 : vector<8x32xf32>
    %12 = math.tanh %11 : vector<8x32xf32>
    %c0_10 = arith.constant 0 : index
    %c0_11 = arith.constant 0 : index
    %13 = vector.load %arg6[%c0_10, %c0_11] : memref<32x32xf32, #tpu.memory_space<vmem>>, vector<32x32xf32>
    %c0_12 = arith.constant 0 : index
    %c0_13 = arith.constant 0 : index
    %14 = vector.load %arg7[%c0_12, %c0_13] : memref<1x32xf32, #tpu.memory_space<vmem>>, vector<1x32xf32>
    %cst_14 = arith.constant dense<0.000000e+00> : vector<8x32xf32>
    %15 = tpu.matmul %12, %13, %cst_14 {dimension_numbers = #tpu.dot_dimension_numbers<[1], [0], [0], [1], [0, 0, 1, 1], [], []>} : vector<8x32xf32>, vector<32x32xf32>, vector<8x32xf32> -> vector<8x32xf32>
    %16 = vector.broadcast %14 : vector<1x32xf32> to vector<8x32xf32>
    %17 = arith.addf %15, %16 : vector<8x32xf32>
    %18 = math.tanh %17 : vector<8x32xf32>
    %c0_15 = arith.constant 0 : index
    %c0_16 = arith.constant 0 : index
    %19 = vector.load %arg8[%c0_15, %c0_16] : memref<32x6xf32, #tpu.memory_space<vmem>>, vector<32x6xf32>
    %c0_17 = arith.constant 0 : index
    %c0_18 = arith.constant 0 : index
    %20 = vector.load %arg9[%c0_17, %c0_18] : memref<1x6xf32, #tpu.memory_space<vmem>>, vector<1x6xf32>
    %cst_19 = arith.constant dense<0.000000e+00> : vector<8x6xf32>
    %21 = tpu.matmul %18, %19, %cst_19 {dimension_numbers = #tpu.dot_dimension_numbers<[1], [0], [0], [1], [0, 0, 1, 1], [], []>} : vector<8x32xf32>, vector<32x6xf32>, vector<8x6xf32> -> vector<8x6xf32>
    %22 = vector.broadcast %20 : vector<1x6xf32> to vector<8x6xf32>
    %23 = arith.addf %21, %22 : vector<8x6xf32>
    %c0_20 = arith.constant 0 : index
    %c0_21 = arith.constant 0 : index
    %24 = vector.load %arg10[%c0_20, %c0_21] : memref<8x6xf32, #tpu.memory_space<vmem>>, vector<8x6xf32>
    tpu.vector_store %arg10[%c0_20, %c0_21], %23 {strides = array<i32>} : memref<8x6xf32, #tpu.memory_space<vmem>>, vector<8x6xf32>,
    return
  }
  func.func @transform_0(%arg0: i32) -> (i32, i32) {
    %c0_i32 = arith.constant 0 : i32
    %c0_i32_0 = arith.constant 0 : i32
    return %arg0, %c0_i32 : i32, i32
  }
  func.func @transform_1(%arg0: i32) -> (i32, i32) {
    %c0_i32 = arith.constant 0 : i32
    %c0_i32_0 = arith.constant 0 : i32
    %c0_i32_1 = arith.constant 0 : i32
    return %c0_i32, %c0_i32_0 : i32, i32
  }
  func.func @transform_2(%arg0: i32) -> (i32, i32) {
    %c0_i32 = arith.constant 0 : i32
    %c0_i32_0 = arith.constant 0 : i32
    %c0_i32_1 = arith.constant 0 : i32
    return %c0_i32, %c0_i32_0 : i32, i32
  }
  func.func @transform_3(%arg0: i32) -> (i32, i32) {
    %c0_i32 = arith.constant 0 : i32
    %c0_i32_0 = arith.constant 0 : i32
    %c0_i32_1 = arith.constant 0 : i32
    return %c0_i32, %c0_i32_0 : i32, i32
  }
  func.func @transform_4(%arg0: i32) -> (i32, i32) {
    %c0_i32 = arith.constant 0 : i32
    %c0_i32_0 = arith.constant 0 : i32
    %c0_i32_1 = arith.constant 0 : i32
    return %c0_i32, %c0_i32_0 : i32, i32
  }
  func.func @transform_5(%arg0: i32) -> (i32, i32) {
    %c0_i32 = arith.constant 0 : i32
    %c0_i32_0 = arith.constant 0 : i32
    %c0_i32_1 = arith.constant 0 : i32
    return %c0_i32, %c0_i32_0 : i32, i32
  }
  func.func @transform_6(%arg0: i32) -> (i32, i32) {
    %c0_i32 = arith.constant 0 : i32
    %c0_i32_0 = arith.constant 0 : i32
    %c0_i32_1 = arith.constant 0 : i32
    return %c0_i32, %c0_i32_0 : i32, i32
  }
  func.func @transform_7(%arg0: i32) -> (i32, i32) {
    %c0_i32 = arith.constant 0 : i32
    %c0_i32_0 = arith.constant 0 : i32
    %c0_i32_1 = arith.constant 0 : i32
    return %c0_i32, %c0_i32_0 : i32, i32
  }
  func.func @transform_8(%arg0: i32) -> (i32, i32) {
    %c0_i32 = arith.constant 0 : i32
    %c0_i32_0 = arith.constant 0 : i32
    %c0_i32_1 = arith.constant 0 : i32
    return %c0_i32, %c0_i32_0 : i32, i32
  }
  func.func @transform_9(%arg0: i32) -> (i32, i32) {
    %c0_i32 = arith.constant 0 : i32
    %c0_i32_0 = arith.constant 0 : i32
    return %arg0, %c0_i32 : i32, i32
  }
}

</mosaic_0001>

<bundles_post_ra>
// kernel: tpu_custom_call.1
= control target key start
LH: loop header
LB: loop body
LE: loop exit
PB: predicated region body
PF: predicated region fallthrough
CT: control target
= control target key end

     0   :  { %14 = vsyncpa [#allocation3], 0  ;;  %s375_s0 = inlined_call_operand.vmem [shape: f32[8,4], index: 0, kind: input, shape index: {}]   ;;  %s376_s1 = inlined_call_operand.vmem [shape: f32[4,32], index: 1, kind: input, shape index: {}]   ;;  %s377_s2 = inlined_call_operand.vmem [shape: f32[1,32], index: 2, kind: input, shape index: {}]   ;;  %s378_s3 = inlined_call_operand.vmem [shape: f32[32,32], index: 3, kind: input, shape index: {}]   ;;  %s379_s4 = inlined_call_operand.vmem [shape: f32[1,32], index: 4, kind: input, shape index: {}]   ;;  %s380_s5 = inlined_call_operand.hbm [shape: f32[32,32], index: 5, kind: input, shape index: {}]   ;;  %s381_s6 = inlined_call_operand.vmem [shape: f32[1,32], index: 6, kind: input, shape index: {}]   ;;  %s382_s7 = inlined_call_operand.vmem [shape: f32[32,6], index: 7, kind: input, shape index: {}]   ;;  %s383_s8 = inlined_call_operand.vmem [shape: f32[1,6], index: 8, kind: input, shape index: {}]   ;;  %s384_s9 = inlined_call_operand.hbm [shape: f32[8,6], index: 9, kind: output, shape index: {}]  }
   0x1   :  { %15 = vsyncpa [#allocation4], 0  ;;  %s30_s11 = sshll.u32 %s380_s5, 4  ;;  %s270_s12 = smov [#allocation2]   ;;  %s31_s11 = int_to_ptr.hbm [resolvable:$true] %s30_s11 }
   0x2   :  { %s32_s13 = sshll.u32 %s270_s12, 4  ;;  %s271_s14 = smov 128   ;;  %s33_s13 = int_to_ptr.vmem [resolvable:$true] %s32_s13 }
   0x3   :  { %s272_s15 = smov 8  }
   0x4   :  { %38 = dma.hbm_to_vmem [thread:$0]  %s31_s11, 512, %s33_s13, [#allocation3], %s271_s14, %s271_s14, %s272_s15  }
   0x5   :  { %266 = dma.done.wait [#allocation3], 512  }
   0x6   :  { %267 = vsyncadd [#allocation3], 4294966784  ;;  %vm59_vm0 = vcmask 1043456   ;;  %vm55_vm1 = vcmask 31744   ;;  %v50_v0 = vld [vmem:[%s376_s1] sm:$0xf] }
   0x7   :  { %v49_v1 = vld [vmem:[%s375_s0] sm:$0xff]  ;;  %199 = vmatpush.msk.msra.mxu0 %vm59_vm0, %v50_v0  ;;  %v87_v2 = vld [vmem:[%s378_s3 + $0x18] sm:$0xff]  ;;  %v86_v3 = vld [vmem:[%s378_s3 + $0x10] sm:$0xff]  ;;  %vm92_vm2 = vcmask 261120   ;;  %s273_s17 = smov [#allocation5]   ;;  %s189_s5 = sshll.u32 %s384_s9, 4  ;;  %s190_s5 = int_to_ptr.hbm [resolvable:$true] %s189_s5 }
   0x8   :  { %200 = vmatmul.msk.f32.vlgmr.msra.gmra.mxu0 %vm55_vm1, %v49_v1  ;;  %108 = vmatpush.msra.mxu1 %v87_v2  ;;  %v85_v4 = vld [vmem:[%s378_s3 + $0x8] sm:$0xff]  ;;  %v84_v5 = vld [vmem:[%s378_s3] sm:$0xff]  ;;  %v120_v10 = vld [vmem:[#allocation2 + $0x18] sm:$0xff]  ;;  %s187_s18 = sshll.u32 %s273_s17, 4  ;;  %vm180_vm3 = vcmask 48128   ;;  %s188_s18 = int_to_ptr.vmem [resolvable:$true] %s187_s18 }
   0x9   :  { %v208_v6 = vld [vmem:[%s377_s2] ss:$0 sm:$0xff]  ;;  %140 = vmatpush.msra.mxu2 %v120_v10  ;;  %v119_v11 = vld [vmem:[#allocation2 + $0x10] sm:$0xff]  ;;  %v118_v12 = vld [vmem:[#allocation2 + $0x8] sm:$0xff] }
   0xa   :  { %109 = vmatpush.msra.mxu1 %v86_v3  ;;  %v117_v13 = vld [vmem:[#allocation2] sm:$0xff]  ;;  %v152_v18 = vld [vmem:[%s382_s7 + $0x18] sm:$0xff]  ;;  %v151_v19 = vld [vmem:[%s382_s7 + $0x10] sm:$0xff] }
   0xb   :  { %141 = vmatpush.msra.mxu2 %v119_v11  ;;  %v209_v14 = vld [vmem:[%s379_s4] ss:$0 sm:$0xff]  ;;  %172 = vmatpush.msra.mxu3 %v152_v18  ;;  %v150_v20 = vld [vmem:[%s382_s7 + $0x8] sm:$0xff] }
   0xc   :  { %110 = vmatpush.msra.mxu1 %v85_v4  ;;  %v149_v21 = vld [vmem:[%s382_s7] sm:$0xff] }
   0xd   :  { %142 = vmatpush.msra.mxu2 %v118_v12  ;;  %173 = vmatpush.msra.mxu3 %v151_v19  ;;  %v210_v22 = vld [vmem:[%s381_s6] ss:$0 sm:$0xff] }
   0xe   :  { %111 = vmatpush.msra.mxu1 %v84_v5  ;;  %v211_v26 = vld [vmem:[%s383_s8] ss:$0 sm:$0xff] }
   0xf   :  { %143 = vmatpush.msra.mxu2 %v117_v13  ;;  %174 = vmatpush.msra.mxu3 %v150_v20 }
  0x11   :  { %175 = vmatpush.msra.mxu3 %v149_v21 }
  0x85   :  { %v80_v7 = vpop.f32.mrf.mxu0 }
  0x86   :  { %v81_v8 = vadd.f32 %v208_v6, %v80_v7 }
  0x88   :  { %212 = vtanh.f32 %v81_v8 }
  0x8e   :  { %v213_v9 = vpop.eup %212 }
  0x8f   :  { %201 = vmatmul.msk.f32.vlgmr.msra.gmra.mxu1 %vm92_vm2, %v213_v9 }
 0x10c   :  { %v113_v15 = vpop.f32.mrf.mxu1 }
 0x10d   :  { %v114_v16 = vadd.f32 %v209_v14, %v113_v15 }
 0x10f   :  { %214 = vtanh.f32 %v114_v16 }
 0x115   :  { %v215_v17 = vpop.eup %214 }
 0x116   :  { %202 = vmatmul.msk.f32.vlgmr.msra.gmra.mxu2 %vm92_vm2, %v215_v17 }
 0x199   :  { %v145_v23 = vpop.f32.mrf.mxu2 }
 0x19a   :  { %v146_v24 = vadd.f32 %v210_v22, %v145_v23 }
 0x19c   :  { %216 = vtanh.f32 %v146_v24 }
 0x1a2   :  { %v217_v25 = vpop.eup %216 }
 0x1a3   :  { %203 = vmatmul.msk.f32.vlgmr.msra.gmra.mxu3 %vm92_vm2, %v217_v25 }
 0x226   :  { %v177_v27 = vpop.f32.mrf.mxu3 }
 0x227   :  { %v178_v28 = vadd.f32 %v211_v26, %v177_v27 }
 0x229   :  { %181 = vst.msk [vmem:[#allocation5] sm:$0xff] %vm180_vm3, %v178_v28 }
 0x22a   :  { %192 = dma.vmem_to_hbm [thread:$0]  %s188_s18, 128, %s190_s5, [#allocation4]  }
 0x22b   :  { %268 = dma.done.wait [#allocation4], 128  }
 0x22c   :  { %269 = vsyncadd [#allocation4], 4294967168 }
 0x22d   :  { %197 = vsyncpa [#allocation3], 1 }
 0x22e   :  { %198 = vsyncpa [#allocation4], 1 }

</bundles_post_ra>
